<compile_context>
chip_gen: v6e
topology: v6e:2x2x1
jax: 0.10.0
libtpu: 0.0.40
codegen_flags: <defaults>
</compile_context>

<pallas_src>
import jax
import jax.numpy as jnp
from jax import lax
from jax.experimental import pallas as pl
from jax.experimental.pallas import tpu as pltpu


# ----------------------------- configuration ------------------------------ #
TIME_FRAME = 5
OBS_PER_FRAME = 8
OBS_DIM = OBS_PER_FRAME * TIME_FRAME            # 40
GOAL_DIM = 4
ACTION_DIM = 4
STATE_DIM = OBS_DIM + GOAL_DIM                  # 44
IN_DIM = OBS_PER_FRAME + GOAL_DIM + ACTION_DIM  # 16 (per-critic MLP input)
HIDDEN = 64                                     # per-critic hidden (small demo size)
FUSED_HIDDEN = 2 * HIDDEN                       # 128 -> one full lane tile
X_COLS = STATE_DIM + ACTION_DIM                 # 48 = 6 x 8 (sublane aligned)
MAX_TB = 256                                    # batch rows per grid step
BATCH = 8


def _round_up(n, m):
    return -(-n // m) * m


def _slab_layout():
    """Row offsets of each packed section inside the (SLAB_ROWS, 128) slab.

    Batch-independent: biases are single rows padded to 8-row sections.
    Every section starts on an 8-row (sublane-tile) boundary.
    """
    off = {}
    r = 0
    off["w1"] = r; r += X_COLS          # (48, 128)  [state rows | action rows]
    off["w2"] = r; r += FUSED_HIDDEN    # (128, 128) block-diagonal
    off["w3"] = r; r += FUSED_HIDDEN    # (128, 128) cols 0/1 used
    off["b1"] = r; r += 8               # row 0 meaningful
    off["b2"] = r; r += 8
    off["b3"] = r; r += 8
    return off, r


_OFF, SLAB_ROWS = _slab_layout()        # 328 rows -> ~164 KiB f32


# ------------------------------ Pallas kernel ------------------------------ #
def _double_critic_kernel(x_ref, slab_ref, out_ref):
    f32 = jnp.float32
    off = _OFF

    w1 = slab_ref[off["w1"]:off["w1"] + X_COLS, :]            # (48, 128)
    w2 = slab_ref[off["w2"]:off["w2"] + FUSED_HIDDEN, :]       # (128, 128)
    w3 = slab_ref[off["w3"]:off["w3"] + FUSED_HIDDEN, :]       # (128, 128)
    b1 = slab_ref[off["b1"]:off["b1"] + 1, :]                  # (1, 128)
    b2 = slab_ref[off["b2"]:off["b2"] + 1, :]
    b3 = slab_ref[off["b3"]:off["b3"] + 1, :]

    # Layer 1: sa = cat([current_obs, goal, action]) @ W1 folded into a single
    # dot against the pre-scattered / zero-padded (48, 128) weight block.
    h = jnp.maximum(
        jnp.dot(x_ref[...], w1, preferred_element_type=f32) + b1, 0.0)
    # Layer 2: both critics at once via block-diagonal W2.
    h = jnp.maximum(
        jnp.dot(h, w2, preferred_element_type=f32) + b2, 0.0)
    # Layer 3: col 0 = q1, col 1 = q2, cols 2..127 are exact zeros.
    q = jnp.dot(h, w3, preferred_element_type=f32) + b3        # (TB, 128)

    # Fuse q_min = min(q1, q2) into lane 2 of the same lane-dense tile so the
    # store stays a single full-width unmasked vst.
    qmin = jnp.minimum(q[:, 0:1], q[:, 1:2])                   # (TB, 1)
    lane = lax.broadcasted_iota(jnp.int32, q.shape, 1)
    out_ref[...] = jnp.where(lane == 2, qmin, q)


# ------------------------------ host wrappers ------------------------------ #
def _fused_out(state, action, slab):
    """Runs the fused kernel; returns the lane-dense (B, 128) result."""
    assert slab.shape == (SLAB_ROWS, FUSED_HIDDEN), "param slab layout mismatch"
    batch = state.shape[0]
    x = jnp.concatenate(
        [state.astype(jnp.float32), action.astype(jnp.float32)], axis=-1)

    tb = batch if batch <= MAX_TB else MAX_TB
    padded = _round_up(batch, tb)
    if padded != batch:                       # pad rows; sliced off below
        x = jnp.pad(x, ((0, padded - batch), (0, 0)))
    grid = (padded // tb,)

    out = pl.pallas_call(
        _double_critic_kernel,
        out_shape=jax.ShapeDtypeStruct((padded, FUSED_HIDDEN), jnp.float32),
        grid_spec=pltpu.PrefetchScalarGridSpec(
            num_scalar_prefetch=0,
            grid=grid,
            in_specs=[
                pl.BlockSpec((tb, X_COLS), lambda i: (i, 0)),
                # Param slab stays resident across all grid steps.
                pl.BlockSpec((SLAB_ROWS, FUSED_HIDDEN), lambda i: (0, 0)),
            ],
            out_specs=pl.BlockSpec((tb, FUSED_HIDDEN), lambda i: (i, 0)),
        ),
        compiler_params=pltpu.CompilerParams(
            dimension_semantics=("parallel",)),   # shard batch across v7x TCs
    )(x, slab)
    return out[:batch]


@jax.jit
def double_critic_forward(state, action, slab):
    """Equivalent of DoubleCriticLastFrame.forward(state, action) -> (q1, q2)."""
    out = _fused_out(state, action, slab)
    return out[:, 0:1], out[:, 1:2]


@jax.jit
def double_critic_q(state, action, slab):
    """Equivalent of DoubleCriticLastFrame.q(state, action) = min(q1, q2)."""
    out = _fused_out(state, action, slab)
    return out[:, 2:3]


# --------------------------- parameter creation ---------------------------- #
def _linear_init(key, fan_in, fan_out):
    # PyTorch nn.Linear default: U(-1/sqrt(fan_in), +1/sqrt(fan_in)).
    # Weights stored as (in, out) (transpose of PyTorch's (out, in)).
    kw, kb = jax.random.split(key)
    bound = 1.0 / jnp.sqrt(jnp.float32(fan_in))
    w = jax.random.uniform(kw, (fan_in, fan_out), jnp.float32, -bound, bound)
    b = jax.random.uniform(kb, (1, fan_out), jnp.float32, -bound, bound)
    return w, b


def _mlp_init(key, in_dim, hidden_dim, out_dim):
    k1, k2, k3 = jax.random.split(key, 3)
    w1, b1 = _linear_init(k1, in_dim, hidden_dim)
    w2, b2 = _linear_init(k2, hidden_dim, hidden_dim)
    w3, b3 = _linear_init(k3, hidden_dim, out_dim)
    return {"w1": w1, "b1": b1, "w2": w2, "b2": b2, "w3": w3, "b3": b3}


def make_params(key):
    kq1, kq2 = jax.random.split(key)
    return {
        "q1": _mlp_init(kq1, IN_DIM, HIDDEN, 1),
        "q2": _mlp_init(kq2, IN_DIM, HIDDEN, 1),
    }


def pack_params(params):
    """Pack all critic parameters into one batch-independent (328, 128) slab.

    Done once, offline (outside the jitted forward).
    """
    off, rows = _slab_layout()
    slab = jnp.zeros((rows, FUSED_HIDDEN), jnp.float32)

    # --- layer 1: fused along output axis, scattered to [state|action] rows ---
    w1f = jnp.concatenate([params["q1"]["w1"], params["q2"]["w1"]], axis=1)  # (16, 128)
    # current_obs = state[:, 0:8]  (first frame of the stacked obs, per reference)
    slab = slab.at[off["w1"]:off["w1"] + OBS_PER_FRAME, :].set(
        w1f[:OBS_PER_FRAME])
    # goal = state[:, 40:44]; the 32 stacked-frame rows in between stay zero.
    slab = slab.at[off["w1"] + OBS_DIM:
                   off["w1"] + OBS_DIM + GOAL_DIM, :].set(
        w1f[OBS_PER_FRAME:OBS_PER_FRAME + GOAL_DIM])
    # action columns 44..47 of the fused input.
    slab = slab.at[off["w1"] + STATE_DIM:
                   off["w1"] + STATE_DIM + ACTION_DIM, :].set(
        w1f[OBS_PER_FRAME + GOAL_DIM:])

    # --- layer 2: block-diagonal fusion ---
    slab = slab.at[off["w2"]:off["w2"] + HIDDEN, 0:HIDDEN].set(params["q1"]["w2"])
    slab = slab.at[off["w2"] + HIDDEN:off["w2"] + FUSED_HIDDEN,
                   HIDDEN:FUSED_HIDDEN].set(params["q2"]["w2"])

    # --- layer 3: q1 -> column 0, q2 -> column 1 ---
    slab = slab.at[off["w3"]:off["w3"] + HIDDEN, 0:1].set(params["q1"]["w3"])
    slab = slab.at[off["w3"] + HIDDEN:off["w3"] + FUSED_HIDDEN, 1:2].set(
        params["q2"]["w3"])

    # --- biases: single meaningful row each (broadcast happens in-kernel) ---
    b1f = jnp.concatenate([params["q1"]["b1"], params["q2"]["b1"]], axis=1)  # (1, 128)
    b2f = jnp.concatenate([params["q1"]["b2"], params["q2"]["b2"]], axis=1)
    slab = slab.at[off["b1"], :].set(b1f[0])
    slab = slab.at[off["b2"], :].set(b2f[0])
    slab = slab.at[off["b3"], 0].set(params["q1"]["b3"][0, 0])
    slab = slab.at[off["b3"], 1].set(params["q2"]["b3"][0, 0])
    return slab


# ----------------------------------- main ---------------------------------- #
if __name__ == "__main__":
    key = jax.random.PRNGKey(0)
    kp, ks, ka = jax.random.split(key, 3)

    params = make_params(kp)
    slab = jax.block_until_ready(pack_params(params))

    state = jax.random.normal(ks, (BATCH, STATE_DIM), jnp.float32)
    action = jax.random.normal(ka, (BATCH, ACTION_DIM), jnp.float32)

    q1, q2 = double_critic_forward(state, action, slab)
    qmin = double_critic_q(state, action, slab)
    q1, q2, qmin = jax.block_until_ready((q1, q2, qmin))

    # pure-JAX reference (unfused, unpacked params) -- matches the PyTorch math
    def ref_mlp(x, p):
        h = jnp.maximum(x @ p["w1"] + p["b1"], 0.0)
        h = jnp.maximum(h @ p["w2"] + p["b2"], 0.0)
        return h @ p["w3"] + p["b3"]

    sa = jnp.concatenate(
        [state[:, :OBS_PER_FRAME],
         state[:, OBS_DIM:OBS_DIM + GOAL_DIM],
         action], axis=-1)
    q1_ref = ref_mlp(sa, params["q1"])
    q2_ref = ref_mlp(sa, params["q2"])

    assert q1.shape == (BATCH, 1) and q2.shape == (BATCH, 1)
    assert qmin.shape == (BATCH, 1)
    assert jnp.allclose(q1, q1_ref, atol=1e-4, rtol=1e-4), "q1 mismatch"
    assert jnp.allclose(q2, q2_ref, atol=1e-4, rtol=1e-4), "q2 mismatch"
    assert jnp.allclose(qmin, jnp.minimum(q1_ref, q2_ref),
                        atol=1e-4, rtol=1e-4), "q_min mismatch"

    print("KERNEL_OK")
</pallas_src>

<mosaic_0001>
module attributes {stable_mosaic.version = 11 : i64} {
  func.func @_double_critic_kernel(%arg0: i32, %arg1: memref<8x48xf32, #tpu.memory_space<vmem>>, %arg2: memref<328x128xf32, #tpu.memory_space<vmem>>, %arg3: memref<8x128xf32, #tpu.memory_space<vmem>>) attributes {dimension_semantics = [#tpu.dimension_semantics<parallel>], iteration_bounds = array<i64: 1>, scalar_prefetch = 0 : i64, scratch_operands = 0 : i64, tpu.core_type = #tpu.core_type<tc>, window_params = [{transform_indices = @transform_0, window_bounds = array<i64: 8, 48>}, {pipeline_mode = #tpu.pipeline_mode<synchronous>, transform_indices = @transform_1, window_bounds = array<i64: 328, 128>}, {transform_indices = @transform_2, window_bounds = array<i64: 8, 128>}]} {
    %c0 = arith.constant 0 : index
    %c0_0 = arith.constant 0 : index
    %0 = vector.load %arg2[%c0, %c0_0] : memref<328x128xf32, #tpu.memory_space<vmem>>, vector<48x128xf32>
    %c48 = arith.constant 48 : index
    %c0_1 = arith.constant 0 : index
    %1 = vector.load %arg2[%c48, %c0_1] : memref<328x128xf32, #tpu.memory_space<vmem>>, vector<128x128xf32>
    %c176 = arith.constant 176 : index
    %c0_2 = arith.constant 0 : index
    %2 = vector.load %arg2[%c176, %c0_2] : memref<328x128xf32, #tpu.memory_space<vmem>>, vector<128x128xf32>
    %c304 = arith.constant 304 : index
    %c0_3 = arith.constant 0 : index
    %3 = vector.load %arg2[%c304, %c0_3] : memref<328x128xf32, #tpu.memory_space<vmem>>, vector<1x128xf32>
    %c312 = arith.constant 312 : index
    %c0_4 = arith.constant 0 : index
    %4 = vector.load %arg2[%c312, %c0_4] : memref<328x128xf32, #tpu.memory_space<vmem>>, vector<1x128xf32>
    %c320 = arith.constant 320 : index
    %c0_5 = arith.constant 0 : index
    %5 = vector.load %arg2[%c320, %c0_5] : memref<328x128xf32, #tpu.memory_space<vmem>>, vector<1x128xf32>
    %c0_6 = arith.constant 0 : index
    %c0_7 = arith.constant 0 : index
    %6 = vector.load %arg1[%c0_6, %c0_7] : memref<8x48xf32, #tpu.memory_space<vmem>>, vector<8x48xf32>
    %cst = arith.constant dense<0.000000e+00> : vector<8x128xf32>
    %7 = tpu.matmul %6, %0, %cst {dimension_numbers = #tpu.dot_dimension_numbers<[1], [0], [0], [1], [0, 0, 1, 1], [], []>} : vector<8x48xf32>, vector<48x128xf32>, vector<8x128xf32> -> vector<8x128xf32>
    %8 = vector.broadcast %3 : vector<1x128xf32> to vector<8x128xf32>
    %9 = arith.addf %7, %8 : vector<8x128xf32>
    %cst_8 = arith.constant 0.000000e+00 : f32
    %10 = vector.broadcast %cst_8 : f32 to vector<8x128xf32>
    %11 = arith.maximumf %9, %10 : vector<8x128xf32>
    %cst_9 = arith.constant dense<0.000000e+00> : vector<8x128xf32>
    %12 = tpu.matmul %11, %1, %cst_9 {dimension_numbers = #tpu.dot_dimension_numbers<[1], [0], [0], [1], [0, 0, 1, 1], [], []>} : vector<8x128xf32>, vector<128x128xf32>, vector<8x128xf32> -> vector<8x128xf32>
    %13 = vector.broadcast %4 : vector<1x128xf32> to vector<8x128xf32>
    %14 = arith.addf %12, %13 : vector<8x128xf32>
    %cst_10 = arith.constant 0.000000e+00 : f32
    %15 = vector.broadcast %cst_10 : f32 to vector<8x128xf32>
    %16 = arith.maximumf %14, %15 : vector<8x128xf32>
    %cst_11 = arith.constant dense<0.000000e+00> : vector<8x128xf32>
    %17 = tpu.matmul %16, %2, %cst_11 {dimension_numbers = #tpu.dot_dimension_numbers<[1], [0], [0], [1], [0, 0, 1, 1], [], []>} : vector<8x128xf32>, vector<128x128xf32>, vector<8x128xf32> -> vector<8x128xf32>
    %18 = vector.broadcast %5 : vector<1x128xf32> to vector<8x128xf32>
    %19 = arith.addf %17, %18 : vector<8x128xf32>
    %20 = vector.extract_strided_slice %19 {offsets = [0, 0], sizes = [8, 1], strides = [1, 1]} : vector<8x128xf32> to vector<8x1xf32>
    %21 = vector.extract_strided_slice %19 {offsets = [0, 1], sizes = [8, 1], strides = [1, 1]} : vector<8x128xf32> to vector<8x1xf32>
    %22 = arith.minimumf %20, %21 : vector<8x1xf32>
    %23 = tpu.iota {dimensions = array<i32: 1>} : vector<8x128xi32>
    %c2_i32 = arith.constant 2 : i32
    %24 = vector.broadcast %c2_i32 : i32 to vector<8x128xi32>
    %25 = arith.cmpi eq, %23, %24 : vector<8x128xi32>
    %26 = vector.shape_cast %22 : vector<8x1xf32> to vector<8x1xf32>
    %27 = vector.broadcast %26 : vector<8x1xf32> to vector<8x128xf32>
    %28 = arith.select %25, %27, %19 : vector<8x128xi1>, vector<8x128xf32>
    %c0_12 = arith.constant 0 : index
    %c0_13 = arith.constant 0 : index
    %29 = vector.load %arg3[%c0_12, %c0_13] : memref<8x128xf32, #tpu.memory_space<vmem>>, vector<8x128xf32>
    tpu.vector_store %arg3[%c0_12, %c0_13], %28 {strides = array<i32>} : memref<8x128xf32, #tpu.memory_space<vmem>>, vector<8x128xf32>,
    return
  }
  func.func @transform_0(%arg0: i32) -> (i32, i32) {
    %c0_i32 = arith.constant 0 : i32
    %c0_i32_0 = arith.constant 0 : i32
    return %arg0, %c0_i32 : i32, i32
  }
  func.func @transform_1(%arg0: i32) -> (i32, i32) {
    %c0_i32 = arith.constant 0 : i32
    %c0_i32_0 = arith.constant 0 : i32
    %c0_i32_1 = arith.constant 0 : i32
    return %c0_i32, %c0_i32_0 : i32, i32
  }
  func.func @transform_2(%arg0: i32) -> (i32, i32) {
    %c0_i32 = arith.constant 0 : i32
    %c0_i32_0 = arith.constant 0 : i32
    return %arg0, %c0_i32 : i32, i32
  }
}

</mosaic_0001>

<bundles_post_ra>
// kernel: double_critic_forward.1
= control target key start
LH: loop header
LB: loop body
LE: loop exit
PB: predicated region body
PF: predicated region fallthrough
CT: control target
= control target key end

     0   :  { %7 = vsyncpa [#allocation3], 0  ;;  %s475_s9 = smov [#allocation2]   ;;  %s550_s0 = inlined_call_operand.vmem [shape: f32[8,48], index: 0, kind: input, shape index: {}]   ;;  %s551_s1 = inlined_call_operand.hbm [shape: f32[328,128], index: 1, kind: input, shape index: {}]   ;;  %s552_s2 = inlined_call_operand.vmem [shape: f32[8,128], index: 2, kind: output, shape index: {}]  }
   0x1   :  { %s15_s10 = sshll.u32 %s475_s9, 4  ;;  %s16_s10 = int_to_ptr.vmem [resolvable:$true] %s15_s10 }
   0x2   :  { %s461_s11 = scalar_lea.vmem %s16_s10, 5248  ;;  %p466_p1 = scmp.lt.s32.totalorder %s16_s10, %s16_s10 }
   0x3   :  { %p462_p0 = scmp.ne.s32.totalorder %s16_s10, %s461_s11  ;;  %p467_p2 = scmp.lt.s32.totalorder %s461_s11, %s461_s11 }
   0x5   :  { %p468_p3 = por %p467_p2, %p466_p1 }
   0x7   :  { %p469_p4 = pnand %p468_p3, %p462_p0 }
   0x9   :  { %472 = shalt.err (!%p469_p4)
}
   0xa   :  { %s476_s12 = smov 128   ;;  %s477_s13 = smov 8  }
   0xb   :  { %21 = dma.hbm_to_vmem [thread:$0]  %s551_s1, 5248, %s16_s10, [#allocation3], %s476_s12, %s476_s12, %s477_s13  }
   0xc   :  { %473 = dma.done.wait [#allocation3], 5248  }
   0xd   :  { %474 = vsyncadd [#allocation3], 4294962048  ;;  %v478_v0 = vmov 0.0   ;;  %vm479_vm0 = vmmov 0   ;;  %v30_v1 = vld [vmem:[#allocation2 + $0x28] sm:$0xff]  ;;  %v29_v2 = vld [vmem:[#allocation2 + $0x20] sm:$0xff]  ;;  %v300_v57 = vlaneseq }
   0xe   :  { %360 = vmatprep.subr.mxu0 %v478_v0  ;;  %372 = vmatprep.mubr.msk.f32.mxu0 %vm479_vm0, %v478_v0  ;;  %v28_v3 = vld [vmem:[#allocation2 + $0x18] sm:$0xff]  ;;  %v46_v4 = vld [vmem:[#allocation2 + $0xa8] sm:$0xff]  ;;  %v45_v5 = vld [vmem:[#allocation2 + $0xa0] sm:$0xff]  ;;  %vm71_vm1 = vcmask 392192   ;;  %v480_v50 = vmov 0  }
   0xf   :  { %375 = vmatprep.subr.mxu1 %v478_v0  ;;  %407 = vmatprep.mubr.msk.f32.mxu1 %vm479_vm0, %v478_v0  ;;  %v27_v6 = vld [vmem:[#allocation2 + $0x10] sm:$0xff]  ;;  %v44_v7 = vld [vmem:[#allocation2 + $0x98] sm:$0xff]  ;;  %v26_v8 = vld [vmem:[#allocation2 + $0x8] sm:$0xff]  ;;  %v301_v58 = vand.u32 127, %v300_v57 }
  0x10   :  { %361 = vmatpush3.msra.mxu0 %v30_v1  ;;  %376 = vmatpush3.msra.mxu1 %v46_v4  ;;  %v43_v9 = vld [vmem:[#allocation2 + $0x90] sm:$0xff]  ;;  %v25_v10 = vld [vmem:[#allocation2] sm:$0xff]  ;;  %v42_v11 = vld [vmem:[#allocation2 + $0x88] sm:$0xff] }
  0x11   :  { %362 = vmatprep.subr.mxu0 %v478_v0  ;;  %377 = vmatprep.subr.mxu1 %v478_v0  ;;  %v66_v12 = vld [vmem:[%s550_s0] sm:$0xff]  ;;  %v40_v14 = vld [vmem:[#allocation2 + $0x78] sm:$0xff]  ;;  %v39_v15 = vld [vmem:[#allocation2 + $0x70] sm:$0xff]  ;;  %s481_s0 = smov 127   ;;  %vm302_vm2 = vcmp.eq.s32.totalorder %v301_v58, 2 }
  0x12   :  { %363 = vmatpush3.msra.mxu0 %v29_v2  ;;  %378 = vmatpush3.msra.mxu1 %v45_v5  ;;  %v41_v13 = vld [vmem:[#allocation2 + $0x80] sm:$0xff]  ;;  %v38_v16 = vld [vmem:[#allocation2 + $0x68] sm:$0xff]  ;;  %v36_v18 = vld [vmem:[#allocation2 + $0x58] sm:$0xff] }
  0x13   :  { %364 = vmatprep.subr.mxu0 %v478_v0  ;;  %379 = vmatprep.subr.mxu1 %v478_v0  ;;  %v37_v17 = vld [vmem:[#allocation2 + $0x60] sm:$0xff]  ;;  %v35_v19 = vld [vmem:[#allocation2 + $0x50] sm:$0xff]  ;;  %v34_v20 = vld [vmem:[#allocation2 + $0x48] sm:$0xff] }
  0x14   :  { %365 = vmatpush3.msra.mxu0 %v28_v3  ;;  %380 = vmatpush3.msra.mxu1 %v44_v7  ;;  %v33_v21 = vld [vmem:[#allocation2 + $0x40] sm:$0xff]  ;;  %v32_v22 = vld [vmem:[#allocation2 + $0x38] sm:$0xff]  ;;  %v31_v23 = vld [vmem:[#allocation2 + $0x30] sm:$0xff] }
  0x15   :  { %366 = vmatprep.subr.mxu0 %v478_v0  ;;  %381 = vmatprep.subr.mxu1 %v478_v0  ;;  %v62_v24 = vld [vmem:[#allocation2 + $0x128] sm:$0xff]  ;;  %v61_v25 = vld [vmem:[#allocation2 + $0x120] sm:$0xff]  ;;  %v60_v26 = vld [vmem:[#allocation2 + $0x118] sm:$0xff] }
  0x16   :  { %367 = vmatpush3.msra.mxu0 %v27_v6  ;;  %382 = vmatpush3.msra.mxu1 %v43_v9  ;;  %v59_v27 = vld [vmem:[#allocation2 + $0x110] sm:$0xff]  ;;  %v58_v28 = vld [vmem:[#allocation2 + $0x108] sm:$0xff]  ;;  %v57_v29 = vld [vmem:[#allocation2 + $0x100] sm:$0xff] }
  0x17   :  { %368 = vmatprep.subr.mxu0 %v478_v0  ;;  %383 = vmatprep.subr.mxu1 %v478_v0  ;;  %v56_v30 = vld [vmem:[#allocation2 + $0xf8] sm:$0xff]  ;;  %v55_v31 = vld [vmem:[#allocation2 + $0xf0] sm:$0xff]  ;;  %v54_v32 = vld [vmem:[#allocation2 + $0xe8] sm:$0xff] }
  0x18   :  { %369 = vmatpush3.msra.mxu0 %v26_v8  ;;  %384 = vmatpush3.msra.mxu1 %v42_v11  ;;  %v53_v33 = vld [vmem:[#allocation2 + $0xe0] sm:$0xff]  ;;  %v52_v34 = vld [vmem:[#allocation2 + $0xd8] sm:$0xff]  ;;  %v51_v35 = vld [vmem:[#allocation2 + $0xd0] sm:$0xff] }
  0x19   :  { %370 = vmatprep.subr.mxu0 %v478_v0  ;;  %385 = vmatprep.subr.mxu1 %v478_v0  ;;  %v50_v36 = vld [vmem:[#allocation2 + $0xc8] sm:$0xff]  ;;  %v315_v37 = vld [vmem:[#allocation2 + $0x130] ss:$0 sm:$0xff]  ;;  %v49_v42 = vld [vmem:[#allocation2 + $0xc0] sm:$0xff] }
  0x1a   :  { %371 = vmatpush3.msra.mxu0 %v25_v10  ;;  %386 = vmatpush3.msra.mxu1 %v41_v13  ;;  %v48_v43 = vld [vmem:[#allocation2 + $0xb8] sm:$0xff]  ;;  %v47_v44 = vld [vmem:[#allocation2 + $0xb0] sm:$0xff]  ;;  %v318_v51 = vld [vmem:[#allocation2 + $0x140] ss:$0 sm:$0xff] }
  0x1b   :  { %373 = vmatmul.mubr.msk.f32.vlgmr.msra.gmra.mxu0 %vm71_vm1, %v66_v12  ;;  %410 = vmatprep.subr.mxu0 %v478_v0  ;;  %v317_v45 = vld [vmem:[#allocation2 + $0x138] ss:$0 sm:$0xff] }
  0x1c   :  { %387 = vmatprep.subr.mxu1 %v478_v0  ;;  %442 = vmatprep.mubr.msk.f32.mxu0 %vm479_vm0, %v478_v0 }
  0x1d   :  { %388 = vmatpush3.msra.mxu1 %v40_v14  ;;  %411 = vmatpush3.msra.mxu0 %v62_v24 }
  0x1e   :  { %389 = vmatprep.subr.mxu1 %v478_v0  ;;  %412 = vmatprep.subr.mxu0 %v478_v0 }
  0x1f   :  { %390 = vmatpush3.msra.mxu1 %v39_v15  ;;  %413 = vmatpush3.msra.mxu0 %v61_v25 }
  0x20   :  { %391 = vmatprep.subr.mxu1 %v478_v0  ;;  %414 = vmatprep.subr.mxu0 %v478_v0 }
  0x21   :  { %392 = vmatpush3.msra.mxu1 %v38_v16  ;;  %415 = vmatpush3.msra.mxu0 %v60_v26 }
  0x22   :  { %393 = vmatprep.subr.mxu1 %v478_v0  ;;  %416 = vmatprep.subr.mxu0 %v478_v0 }
  0x23   :  { %394 = vmatpush3.msra.mxu1 %v37_v17  ;;  %417 = vmatpush3.msra.mxu0 %v59_v27 }
  0x24   :  { %395 = vmatprep.subr.mxu1 %v478_v0  ;;  %418 = vmatprep.subr.mxu0 %v478_v0 }
  0x25   :  { %396 = vmatpush3.msra.mxu1 %v36_v18  ;;  %419 = vmatpush3.msra.mxu0 %v58_v28 }
  0x26   :  { %397 = vmatprep.subr.mxu1 %v478_v0  ;;  %420 = vmatprep.subr.mxu0 %v478_v0 }
  0x27   :  { %398 = vmatpush3.msra.mxu1 %v35_v19  ;;  %421 = vmatpush3.msra.mxu0 %v57_v29 }
  0x28   :  { %399 = vmatprep.subr.mxu1 %v478_v0  ;;  %422 = vmatprep.subr.mxu0 %v478_v0 }
  0x29   :  { %400 = vmatpush3.msra.mxu1 %v34_v20  ;;  %423 = vmatpush3.msra.mxu0 %v56_v30 }
  0x2a   :  { %401 = vmatprep.subr.mxu1 %v478_v0  ;;  %424 = vmatprep.subr.mxu0 %v478_v0 }
  0x2b   :  { %402 = vmatpush3.msra.mxu1 %v33_v21  ;;  %425 = vmatpush3.msra.mxu0 %v55_v31 }
  0x2c   :  { %403 = vmatprep.subr.mxu1 %v478_v0  ;;  %426 = vmatprep.subr.mxu0 %v478_v0 }
  0x2d   :  { %404 = vmatpush3.msra.mxu1 %v32_v22  ;;  %427 = vmatpush3.msra.mxu0 %v54_v32 }
  0x2e   :  { %405 = vmatprep.subr.mxu1 %v478_v0  ;;  %428 = vmatprep.subr.mxu0 %v478_v0 }
  0x2f   :  { %406 = vmatpush3.msra.mxu1 %v31_v23  ;;  %429 = vmatpush3.msra.mxu0 %v53_v33 }
  0x30   :  { %430 = vmatprep.subr.mxu0 %v478_v0  ;;  %452 = vset.pattern.permute.xlu0 %v480_v50 }
  0x31   :  { %431 = vmatpush3.msra.mxu0 %v52_v34 }
  0x32   :  { %432 = vmatprep.subr.mxu0 %v478_v0 }
  0x33   :  { %433 = vmatpush3.msra.mxu0 %v51_v35 }
  0x34   :  { %434 = vmatprep.subr.mxu0 %v478_v0 }
  0x35   :  { %435 = vmatpush3.msra.mxu0 %v50_v36 }
  0x36   :  { %436 = vmatprep.subr.mxu0 %v478_v0 }
  0x37   :  { %437 = vmatpush3.msra.mxu0 %v49_v42 }
  0x38   :  { %438 = vmatprep.subr.mxu0 %v478_v0 }
  0x39   :  { %439 = vmatpush3.msra.mxu0 %v48_v43 }
  0x3a   :  { %440 = vmatprep.subr.mxu0 %v478_v0 }
  0x3b   :  { %441 = vmatpush3.msra.mxu0 %v47_v44 }
  0xdb   :  { %v141_v38 = vpop.f32.mrf.mxu0 }
  0xdc   :  { %v142_v39 = vadd.f32 %v315_v37, %v141_v38 }
  0xdd   :  { %v374_v40 = vpop.f32.mrf.mxu0 }
  0xde   :  { %v145_v41 = vmax.f32 %v142_v39, 0.0 }
  0xe0   :  { %408 = vmatmul.mubr.f32.vlgmr.msra.gmra.mxu1 %v145_v41 }
 0x1a0   :  { %v216_v46 = vpop.f32.mrf.mxu1 }
 0x1a1   :  { %v217_v47 = vadd.f32 %v317_v45, %v216_v46 }
 0x1a2   :  { %v409_v48 = vpop.f32.mrf.mxu1 }
 0x1a3   :  { %v220_v49 = vmax.f32 %v217_v47, 0.0 }
 0x1a5   :  { %443 = vmatmul.mubr.f32.vlgmr.msra.gmra.mxu0 %v220_v49 }
 0x265   :  { %v291_v52 = vpop.f32.mrf.mxu0 }
 0x266   :  { %v292_v53 = vadd.f32 %v318_v51, %v291_v52 }
 0x267   :  { %v444_v54 = vpop.f32.mrf.mxu0 }
 0x268   :  { %296 = vrot.lane.b32.xlu0 %v292_v53, %s481_s0 }
 0x2da   :  { %v297_v55 = vpop.permute.xlu0 %296 }
 0x2db   :  { %v299_v56 = vmin.f32 %v292_v53, %v297_v55 }
 0x2dd   :  { %305 = vperm.xlu0 %452, %v299_v56  }
 0x358   :  { %v306_v59 = vpop.permute.xlu0 %305 }
 0x359   :  { %v308_v60 = vsel %vm302_vm2, %v306_v59, %v292_v53 }
 0x35a   :  { %309 = vst [vmem:[%s552_s2] sm:$0xff] %v308_v60 }
 0x35b   :  { %314 = vsyncpa [#allocation3], 1 }

</bundles_post_ra>
